<compile_context>
chip_gen: v7x
topology: tpu7x:2x2x1
jax: 0.10.0
libtpu: 0.0.40
codegen_flags: <defaults>
</compile_context>

<pallas_src>
import functools

import jax
import jax.numpy as jnp
from jax.experimental import pallas as pl
from jax.experimental.pallas import tpu as pltpu


def _pick_tile(dim, candidates=(256, 128, 64, 32, 16, 8)):
    for c in candidates:
        if c <= dim and dim % c == 0:
            return c
    return dim


# --------------------- 1) tiled bf16 matmul (projections) ------------------- #

def _linear_kernel(x_ref, w_ref, o_ref, acc_ref):
    @pl.when(pl.program_id(2) == 0)
    def _():
        acc_ref[...] = jnp.zeros_like(acc_ref)

    acc_ref[...] += jnp.dot(
        x_ref[...].astype(jnp.bfloat16), w_ref[...].astype(jnp.bfloat16),
        preferred_element_type=jnp.float32)

    @pl.when(pl.program_id(2) == pl.num_programs(2) - 1)
    def _():
        o_ref[...] = acc_ref[...].astype(o_ref.dtype)


def linear_pallas(x, w_t):
    """y = x @ w_t with (M, N, K) tiling, bf16 MXU inputs, f32 accumulation."""
    T, H = x.shape
    O = w_t.shape[1]
    tm = _pick_tile(T, (256, 128, 64, 32, 16, 8))
    tn = _pick_tile(O, (256, 128))
    tk = _pick_tile(H, (512, 256, 128))
    return pl.pallas_call(
        _linear_kernel,
        out_shape=jax.ShapeDtypeStruct((T, O), jnp.float32),
        grid=(T // tm, O // tn, H // tk),
        in_specs=[
            pl.BlockSpec((tm, tk), lambda i, j, k: (i, k)),
            pl.BlockSpec((tk, tn), lambda i, j, k: (k, j)),
        ],
        out_specs=pl.BlockSpec((tm, tn), lambda i, j, k: (i, j)),
        scratch_shapes=[pltpu.VMEM((tm, tn), jnp.float32)],
        compiler_params=pltpu.CompilerParams(
            dimension_semantics=("parallel", "parallel", "arbitrary"),
            vmem_limit_bytes=32 * 1024 * 1024),
    )(x, w_t)


# ----------------- 2) fused per-head Cohere LayerNorm + rotary --------------- #

def _normrope_kernel(x_ref, w_ref, cos_ref, sin_ref, o_ref, *,
                     heads, head_size, eps, use_qk_norm):
    D = head_size
    HD = heads * D
    half = D // 2
    f32 = jnp.float32

    x = x_ref[...].astype(f32)                                   # (TB, HD)

    if use_qk_norm:
        # Per-head mean/variance via a block-diagonal averaging matmul (MXU);
        # avoids in-kernel reshapes of the lane-dense [TB, HD] block.
        # NOTE: P/R are (HD, HD); for very large HD replace with skinny
        # indicator matmuls / pltpu.roll.
        bi = jax.lax.broadcasted_iota(jnp.int32, (HD, HD), 0) // D
        bj = jax.lax.broadcasted_iota(jnp.int32, (HD, HD), 1) // D
        P = jnp.where(bi == bj, 1.0 / D, 0.0).astype(f32)
        mean = jnp.dot(x, P, preferred_element_type=f32)
        xc = x - mean
        var = jnp.dot(xc * xc, P, preferred_element_type=f32)
        x = xc * jax.lax.rsqrt(var + eps) * w_ref[...].astype(f32)

    # Rotary.  Per head the layout is [x_even | x_odd] (the de-interleave
    # permutation was folded into the projection weights at init), so Cohere's
    # interleaved rotary becomes a contiguous-halves rotation.
    c = cos_ref[...].astype(f32)                                 # (TB, half)
    s = sin_ref[...].astype(f32)
    ci = jax.lax.broadcasted_iota(jnp.int32, (half, HD), 0)
    cj = jax.lax.broadcasted_iota(jnp.int32, (half, HD), 1)
    B = jnp.where(ci == (cj % half), 1.0, 0.0).astype(f32)       # lane broadcast
    c_full = jnp.dot(c, B, preferred_element_type=f32)           # (TB, HD)
    s_full = jnp.dot(s, B, preferred_element_type=f32)

    ri = jax.lax.broadcasted_iota(jnp.int32, (HD, HD), 0)
    rj = jax.lax.broadcasted_iota(jnp.int32, (HD, HD), 1)
    src = jnp.where((rj % D) < half, rj + half, rj - half)       # rope partner lane
    R = jnp.where(ri == src, 1.0, 0.0).astype(f32)
    partner = jnp.dot(x, R, preferred_element_type=f32)          # (TB, HD)

    lane = jax.lax.broadcasted_iota(jnp.int32, x.shape, 1)
    sign = jnp.where((lane % D) < half, -1.0, 1.0).astype(f32)
    o_ref[...] = (x * c_full + partner * (sign * s_full)).astype(o_ref.dtype)


def qknorm_rope_pallas(x, w_flat, cos, sin, *, heads, head_size, eps,
                       use_qk_norm=True):
    T, HD = x.shape
    assert HD == heads * head_size
    half = head_size // 2
    tb = _pick_tile(T)
    kern = functools.partial(_normrope_kernel, heads=heads, head_size=head_size,
                             eps=eps, use_qk_norm=use_qk_norm)
    return pl.pallas_call(
        kern,
        out_shape=jax.ShapeDtypeStruct((T, HD), x.dtype),
        grid=(T // tb,),
        in_specs=[
            pl.BlockSpec((tb, HD), lambda t: (t, 0)),
            pl.BlockSpec((1, HD), lambda t: (0, 0)),
            pl.BlockSpec((tb, half), lambda t: (t, 0)),
            pl.BlockSpec((tb, half), lambda t: (t, 0)),
        ],
        out_specs=pl.BlockSpec((tb, HD), lambda t: (t, 0)),
        compiler_params=pltpu.CompilerParams(
            dimension_semantics=("parallel",),
            vmem_limit_bytes=32 * 1024 * 1024),
    )(x, w_flat, cos, sin)


# ----------------------- 3) causal flash attention (GQA) -------------------- #

def _flash_attn_kernel(q_ref, k_ref, v_ref, o_ref, m_sc, l_sc, acc_sc, *,
                       groups, head_size, scale, tq_size, tk_size):
    D = head_size
    tq = pl.program_id(1)
    tk = pl.program_id(2)

    @pl.when(tk == 0)
    def _():
        m_sc[...] = jnp.full_like(m_sc, -jnp.inf)
        l_sc[...] = jnp.zeros_like(l_sc)
        acc_sc[...] = jnp.zeros_like(acc_sc)

    # Skip fully masked (strictly upper-triangular) KV tiles (~2x fewer flops).
    @pl.when(tk <= tq)
    def _():
        k = k_ref[0].astype(jnp.bfloat16)                        # (TK, D)
        v = v_ref[0].astype(jnp.bfloat16)                        # (TK, D)
        row = (jax.lax.broadcasted_iota(jnp.int32, (tq_size, tk_size), 0)
               + tq * tq_size)
        col = (jax.lax.broadcasted_iota(jnp.int32, (tq_size, tk_size), 1)
               + tk * tk_size)
        mask = col <= row
        for g in range(groups):                                   # K/V stay resident
            q_g = q_ref[:, g * D:(g + 1) * D].astype(jnp.bfloat16)
            s = jax.lax.dot_general(
                q_g, k, (((1,), (1,)), ((), ())),
                preferred_element_type=jnp.float32) * scale
            s = jnp.where(mask, s, -1e30)
            m_prev = m_sc[g]                                      # (TQ, 1)
            m_new = jnp.maximum(m_prev, jnp.max(s, axis=-1, keepdims=True))
            alpha = jnp.exp(m_prev - m_new)
            p = jnp.exp(s - m_new)
            l_sc[g] = alpha * l_sc[g] + jnp.sum(p, axis=-1, keepdims=True)
            acc_sc[:, g * D:(g + 1) * D] = (
                alpha * acc_sc[:, g * D:(g + 1) * D]
                + jnp.dot(p.astype(jnp.bfloat16), v,
                          preferred_element_type=jnp.float32))
            m_sc[g] = m_new

    # Last contributing KV tile for this Q tile (TQ == TK -> tk == tq).
    @pl.when(tk == tq)
    def _():
        for g in range(groups):
            inv_l = pl.reciprocal(l_sc[g], approx=True)
            o_ref[:, g * D:(g + 1) * D] = (
                acc_sc[:, g * D:(g + 1) * D] * inv_l).astype(o_ref.dtype)


def flash_attention_pallas(q, k_h, v_h, *, num_heads, num_kv_heads, head_size,
                           softmax_scale):
    """q: [T, Hq*D] (lane-dense), k_h/v_h: [Hk, T, D].  Returns [T, Hq*D]."""
    T = q.shape[0]
    D = head_size
    groups = num_heads // num_kv_heads
    assert (groups * D) % 128 == 0 or num_kv_heads == 1, (
        "q/out BlockSpec needs a lane-dense (groups*head_size) multiple of 128")
    tile = _pick_tile(T)
    kern = functools.partial(_flash_attn_kernel, groups=groups, head_size=D,
                             scale=softmax_scale, tq_size=tile, tk_size=tile)
    return pl.pallas_call(
        kern,
        out_shape=jax.ShapeDtypeStruct((T, num_heads * D), q.dtype),
        grid=(num_kv_heads, T // tile, T // tile),
        in_specs=[
            pl.BlockSpec((tile, groups * D), lambda h, i, j: (i, h)),
            pl.BlockSpec((1, tile, D), lambda h, i, j: (h, j, 0)),
            pl.BlockSpec((1, tile, D), lambda h, i, j: (h, j, 0)),
        ],
        out_specs=pl.BlockSpec((tile, groups * D), lambda h, i, j: (i, h)),
        scratch_shapes=[
            pltpu.VMEM((groups, tile, 1), jnp.float32),   # m
            pltpu.VMEM((groups, tile, 1), jnp.float32),   # l
            pltpu.VMEM((tile, groups * D), jnp.float32),  # acc
        ],
        compiler_params=pltpu.CompilerParams(
            dimension_semantics=("parallel", "parallel", "arbitrary"),
            vmem_limit_bytes=32 * 1024 * 1024),
    )(q, k_h, v_h)


# ------------------------------ Module wrapper ------------------------------ #

class FlashCohereAttentionPallas:
    """Mirrors FlashCohereAttention.forward (prefill branch) with Pallas kernels."""

    def __init__(self, key, hidden_size, num_heads, num_kv_heads,
                 use_qk_norm=True, eps=1e-5):
        assert hidden_size % num_heads == 0
        self.num_heads = num_heads
        self.num_kv_heads = num_kv_heads
        self.head_size = hidden_size // num_heads
        self.hidden_size = hidden_size
        self.softmax_scale = self.head_size ** -0.5
        self.use_qk_norm = use_qk_norm
        self.eps = eps
        self.num_groups = num_heads // num_kv_heads
        D = self.head_size

        kq, ko, kqn, kkn = jax.random.split(key, 4)
        qkv_out = (num_heads + 2 * num_kv_heads) * D
        # torch-style [out, in] weights, rounded to bf16 once (master copy) so
        # the bf16 kernels and the f32 reference use identical weight values.
        w_qkv = (jax.random.normal(kq, (qkv_out, hidden_size), jnp.float32)
                 * 0.02).astype(jnp.bfloat16)
        w_o = (jax.random.normal(ko, (hidden_size, num_heads * D), jnp.float32)
               * 0.02).astype(jnp.bfloat16)

        wqkv_t = jnp.transpose(w_qkv)                 # [hidden, qkv_out]
        self.wqkv_t_ref = wqkv_t.astype(jnp.float32)  # reference copy (unpermuted)
        # Fold the rotary de-interleave permutation (even|odd halves) into the
        # q/k output columns so no runtime gathers are needed.  q/k features
        # then live permuted everywhere downstream; attention scores are
        # invariant to a shared feature permutation and v is untouched.
        perm = jnp.concatenate([jnp.arange(0, D, 2), jnp.arange(1, D, 2)])
        col = jnp.arange(qkv_out)
        head, within = col // D, col % D
        src_col = jnp.where(col < (num_heads + num_kv_heads) * D,
                            head * D + perm[within], col)
        self.wqkv_t = wqkv_t[:, src_col]              # bf16, permuted q/k columns
        self.wo_t = jnp.transpose(w_o)                # bf16 [num_heads*D, hidden]
        self.wo_t_ref = self.wo_t.astype(jnp.float32)

        q_norm_w = 1.0 + 0.1 * jax.random.normal(kqn, (num_heads, D), jnp.float32)
        k_norm_w = 1.0 + 0.1 * jax.random.normal(kkn, (num_kv_heads, D), jnp.float32)
        self.q_norm_w = q_norm_w                      # reference layout [heads, D]
        self.k_norm_w = k_norm_w
        self.q_norm_w_flat = q_norm_w[:, perm].reshape(1, num_heads * D)
        self.k_norm_w_flat = k_norm_w[:, perm].reshape(1, num_kv_heads * D)
        # attention_bias = False (Cohere default) -> no q/k/v/o biases.

    def __call__(self, hidden_states, cos, sin, slots, kv_cache):
        T = hidden_states.shape[0]
        Hq, Hk, D = self.num_heads, self.num_kv_heads, self.head_size

        # qkv projection (tiled bf16 MXU matmul)
        qkv = linear_pallas(hidden_states, self.wqkv_t)
        q, k, v = jnp.split(qkv, [Hq * D, (Hq + Hk) * D], axis=1)

        # fused per-head Cohere LayerNorm + rotary, lane-dense [T, H*D] layout
        q = qknorm_rope_pallas(q, self.q_norm_w_flat, cos, sin, heads=Hq,
                               head_size=D, eps=self.eps,
                               use_qk_norm=self.use_qk_norm)
        k = qknorm_rope_pallas(k, self.k_norm_w_flat, cos, sin, heads=Hk,
                               head_size=D, eps=self.eps,
                               use_qk_norm=self.use_qk_norm)

        # kv_cache.store(key, value, slots).  The cache holds k in the permuted
        # (de-interleaved) feature layout; a decode kernel must read it the
        # same way.
        # TODO(synk): fuse this scatter into a Pallas kernel using scalar-
        # prefetched slots + input_output_aliases on the cache.
        k3 = k.reshape(T, Hk, D)
        v3 = v.reshape(T, Hk, D)
        key_cache, value_cache = kv_cache
        key_cache = key_cache.at[slots].set(k3)
        value_cache = value_cache.at[slots].set(v3)

        # Prefill path (cu_seqlen_prefill is not None): causal flash attention.
        # q and the attention output stay lane-dense [T, Hq*D]; only the small
        # k/v are rearranged per kv-head.
        # TODO(synk): decode-time paged_attention + fp8 kv_scales not implemented.
        k_h = jnp.transpose(k3, (1, 0, 2))
        v_h = jnp.transpose(v3, (1, 0, 2))
        attn = flash_attention_pallas(
            q, k_h, v_h, num_heads=Hq, num_kv_heads=Hk, head_size=D,
            softmax_scale=self.softmax_scale)

        # o_proj (reduce=False -> no all-reduce; single shard here).
        out = linear_pallas(attn, self.wo_t)
        return out, (key_cache, value_cache)


# ------------------------------ Pure-JAX reference -------------------------- #

def reference_forward(mod, hidden_states, cos, sin):
    T = hidden_states.shape[0]
    Hq, Hk, D = mod.num_heads, mod.num_kv_heads, mod.head_size
    qkv = hidden_states @ mod.wqkv_t_ref
    q, k, v = jnp.split(qkv, [Hq * D, (Hq + Hk) * D], axis=1)

    def cohere_ln(x, w):
        x = x.reshape(-1, w.shape[0], w.shape[1]).astype(jnp.float32)
        mean = x.mean(-1, keepdims=True)
        xc = x - mean
        var = (xc * xc).mean(-1, keepdims=True)
        xn = xc * jax.lax.rsqrt(var + mod.eps)
        return w.astype(jnp.float32) * xn

    if mod.use_qk_norm:
        q = cohere_ln(q, mod.q_norm_w)
        k = cohere_ln(k, mod.k_norm_w)
    q = q.reshape(T, Hq, D)
    k = k.reshape(T, Hk, D)
    v = v.reshape(T, Hk, D).astype(jnp.float32)

    def rope(x):
        x1 = x[..., 0::2]
        x2 = x[..., 1::2]
        c = cos[:, None, :]
        s = sin[:, None, :]
        o1 = x1 * c - x2 * s
        o2 = x1 * s + x2 * c
        return jnp.stack([o1, o2], axis=-1).reshape(x.shape)

    q = rope(q)
    k = rope(k)
    groups = Hq // Hk
    k_full = jnp.repeat(k, groups, axis=1)
    v_full = jnp.repeat(v, groups, axis=1)
    s = jnp.einsum('thd,shd->hts', q, k_full) * mod.softmax_scale
    mask = jnp.tril(jnp.ones((T, T), dtype=bool))
    s = jnp.where(mask[None], s, -1e30)
    p = jax.nn.softmax(s, axis=-1)
    o = jnp.einsum('hts,shd->thd', p, v_full)
    return o.reshape(T, Hq * D) @ mod.wo_t_ref


# ----------------------------------- Main ----------------------------------- #

if __name__ == "__main__":
    hidden_size = 256
    num_heads = 4
    num_kv_heads = 2
    head_size = hidden_size // num_heads      # 64
    T = 64                                    # flattened prefill tokens
    num_slots = 128

    key = jax.random.PRNGKey(0)
    k_mod, k_x = jax.random.split(key)
    mod = FlashCohereAttentionPallas(k_mod, hidden_size, num_heads, num_kv_heads,
                                     use_qk_norm=True, eps=1e-5)

    hidden_states = jax.random.normal(k_x, (T, hidden_size), jnp.float32)

    # Rotary tables (cos/sin per position, half head_size).
    inv_freq = 1.0 / (10000.0 ** (jnp.arange(0, head_size, 2, dtype=jnp.float32)
                                  / head_size))
    pos = jnp.arange(T, dtype=jnp.float32)
    angles = pos[:, None] * inv_freq[None, :]             # [T, head_size//2]
    cos = jnp.cos(angles)
    sin = jnp.sin(angles)

    slots = jnp.arange(T, dtype=jnp.int32)
    kv_cache = (jnp.zeros((num_slots, num_kv_heads, head_size), jnp.float32),
                jnp.zeros((num_slots, num_kv_heads, head_size), jnp.float32))

    out, (key_cache, value_cache) = mod(hidden_states, cos, sin, slots, kv_cache)
    out = jax.block_until_ready(out)

    ref = jax.block_until_ready(reference_forward(mod, hidden_states, cos, sin))
    assert out.shape == (T, hidden_size)
    err = float(jnp.max(jnp.abs(out - ref)))
    assert bool(jnp.allclose(out, ref, atol=2e-2, rtol=2e-2)), f"max abs err {err}"

    print("KERNEL_OK")
</pallas_src>

<mosaic_0001>
module attributes {stable_mosaic.version = 11 : i64} {
  func.func @_linear_kernel(%arg0: i32, %arg1: i32, %arg2: i32, %arg3: memref<64x256xf32, #tpu.memory_space<vmem>>, %arg4: memref<256x256xbf16, #tpu.memory_space<vmem>>, %arg5: memref<64x256xf32, #tpu.memory_space<vmem>>, %arg6: memref<64x256xf32, #tpu.memory_space<vmem>>) attributes {dimension_semantics = [#tpu.dimension_semantics<parallel>, #tpu.dimension_semantics<parallel>, #tpu.dimension_semantics<arbitrary>], iteration_bounds = array<i64: 1, 2, 1>, scalar_prefetch = 0 : i64, scratch_operands = 1 : i64, tpu.core_type = #tpu.core_type<tc>, window_params = [{transform_indices = @transform_0, window_bounds = array<i64: 64, 256>}, {transform_indices = @transform_1, window_bounds = array<i64: 256, 256>}, {transform_indices = @transform_2, window_bounds = array<i64: 64, 256>}]} {
    %c0_i32 = arith.constant 0 : i32
    %0 = arith.cmpi eq, %arg2, %c0_i32 : i32
    %1 = arith.extui %0 : i1 to i32
    %c0_i32_0 = arith.constant 0 : i32
    %2 = arith.cmpi ne, %1, %c0_i32_0 : i32
    scf.if %2 {
      %cst_10 = arith.constant 0.000000e+00 : f32
      %13 = vector.broadcast %cst_10 : f32 to vector<64x256xf32>
      %c0_11 = arith.constant 0 : index
      %c0_12 = arith.constant 0 : index
      %14 = vector.load %arg6[%c0_11, %c0_12] : memref<64x256xf32, #tpu.memory_space<vmem>>, vector<64x256xf32>
      tpu.vector_store %arg6[%c0_11, %c0_12], %13 {strides = array<i32>} : memref<64x256xf32, #tpu.memory_space<vmem>>, vector<64x256xf32>,
    } else {
    }
    %c0 = arith.constant 0 : index
    %c0_1 = arith.constant 0 : index
    %3 = vector.load %arg6[%c0, %c0_1] : memref<64x256xf32, #tpu.memory_space<vmem>>, vector<64x256xf32>
    %c0_2 = arith.constant 0 : index
    %c0_3 = arith.constant 0 : index
    %4 = vector.load %arg3[%c0_2, %c0_3] : memref<64x256xf32, #tpu.memory_space<vmem>>, vector<64x256xf32>
    %5 = arith.truncf %4 : vector<64x256xf32> to vector<64x256xbf16>
    %c0_4 = arith.constant 0 : index
    %c0_5 = arith.constant 0 : index
    %6 = vector.load %arg4[%c0_4, %c0_5] : memref<256x256xbf16, #tpu.memory_space<vmem>>, vector<256x256xbf16>
    %cst = arith.constant dense<0.000000e+00> : vector<64x256xf32>
    %7 = tpu.matmul %5, %6, %cst {dimension_numbers = #tpu.dot_dimension_numbers<[1], [0], [0], [1], [0, 0, 1, 1], [], []>} : vector<64x256xbf16>, vector<256x256xbf16>, vector<64x256xf32> -> vector<64x256xf32>
    %8 = arith.addf %3, %7 : vector<64x256xf32>
    %c0_6 = arith.constant 0 : index
    %c0_7 = arith.constant 0 : index
    %9 = vector.load %arg6[%c0_6, %c0_7] : memref<64x256xf32, #tpu.memory_space<vmem>>, vector<64x256xf32>
    tpu.vector_store %arg6[%c0_6, %c0_7], %8 {strides = array<i32>} : memref<64x256xf32, #tpu.memory_space<vmem>>, vector<64x256xf32>,
    %c0_i32_8 = arith.constant 0 : i32
    %10 = arith.cmpi eq, %arg2, %c0_i32_8 : i32
    %11 = arith.extui %10 : i1 to i32
    %c0_i32_9 = arith.constant 0 : i32
    %12 = arith.cmpi ne, %11, %c0_i32_9 : i32
    scf.if %12 {
      %c0_10 = arith.constant 0 : index
      %c0_11 = arith.constant 0 : index
      %13 = vector.load %arg6[%c0_10, %c0_11] : memref<64x256xf32, #tpu.memory_space<vmem>>, vector<64x256xf32>
      %c0_12 = arith.constant 0 : index
      %c0_13 = arith.constant 0 : index
      %14 = vector.load %arg5[%c0_12, %c0_13] : memref<64x256xf32, #tpu.memory_space<vmem>>, vector<64x256xf32>
      tpu.vector_store %arg5[%c0_12, %c0_13], %13 {strides = array<i32>} : memref<64x256xf32, #tpu.memory_space<vmem>>, vector<64x256xf32>,
    } else {
    }
    return
  }
  func.func @transform_0(%arg0: i32, %arg1: i32, %arg2: i32) -> (i32, i32) {
    %c0_i32 = arith.constant 0 : i32
    return %arg0, %arg2 : i32, i32
  }
  func.func @transform_1(%arg0: i32, %arg1: i32, %arg2: i32) -> (i32, i32) {
    %c0_i32 = arith.constant 0 : i32
    return %arg2, %arg1 : i32, i32
  }
  func.func @transform_2(%arg0: i32, %arg1: i32, %arg2: i32) -> (i32, i32) {
    %c0_i32 = arith.constant 0 : i32
    return %arg0, %arg1 : i32, i32
  }
}

</mosaic_0001>

<bundles_post_ra>
// kernel: tpu_custom_call.1
= control target key start
LH: loop header
LB: loop body
LE: loop exit
PB: predicated region body
PF: predicated region fallthrough
CT: control target
= control target key end

     0   :  { %7 = vsyncpa [#allocation4], 0  ;;  %s1397_s0 = inlined_call_operand.hbm [shape: f32[64,256], index: 0, kind: input, shape index: {}]   ;;  %s1398_s1 = inlined_call_operand.hbm [shape: bf16[256,512], index: 1, kind: input, shape index: {}]   ;;  %s1399_s2 = inlined_call_operand.hbm [shape: f32[64,512], index: 2, kind: output, shape index: {}]  }
   0x1   :  { %8 = vsyncpa [#allocation7], 0 }
   0x2   :  { %10 = vsyncpa [#allocation7 + $0x1], 0 }
   0x3   :  { %11 = vsyncpa [#allocation5], 0 }
   0x4   :  { %13 = vsyncpa [#allocation5 + $0x1], 0  ;;  %s1120_s9 = smov 0   ;;  %s1122_s10 = smov 0  }
   0x5   :  { %s1124_s11 = smov 0   ;;  %s1126_s12 = smov 0  }
   0x6   :  { %s1128_s13 = smov 0   ;;  %s1130_s14 = smov 0  }
   0x7 LB: > { %s738_s15 = sadd.s32 4294967295, %s1093_s14   ;;  %s739_s16 = sadd.s32 4294967294, %s1093_s14   ;;  %s1093_s14 = sphi %s1130_s14, %s19_s14   ;;  %s1089_s13 = sphi %s1128_s13, %s1425_s13   ;;  %s1085_s12 = sphi %s1126_s12, %s1424_s12   ;;  %s1081_s11 = sphi %s1124_s11, %s1423_s11   ;;  %s1077_s10 = sphi %s1122_s10, %s1422_s10   ;;  %s1073_s9 = sphi %s1120_s9, %s1421_s9  }
   0x8   : > { %p82_p0 = scmp.ne.s32.totalorder %s1081_s11, %s1077_s10  ;;  %p83_p1 = scmp.eq.s32.totalorder %s1093_s14, 0 }
   0x9   : > { %p88_p2 = scmp.ne.s32.totalorder %s1077_s10, %s1073_s9  ;;  %p1157_p3 = scmp.eq.s32.totalorder %s738_s15, 0 }
   0xa   : > { %p1161_p4 = por %p83_p1, %p82_p0  ;;  %p114_p5 = scmp.eq.s32.totalorder %s738_s15, 1 }
   0xb   : > { %s1406_s17 = scalar_select %p1157_p3, 1, 0 }
   0xc   : > { %p1167_p6 = por %p1157_p3, %p88_p2  ;;  %p120_p7 = scmp.eq.s32.totalorder %s739_s16, 1 }
   0xd   : > { %p1171_p8 = por %p114_p5, %p82_p0  ;;  %p740_p9 = scmp.ge.s32.totalorder %s1093_s14, 1 }
   0xe   : > { %s1408_s19 = scalar_select %p1167_p6, 1, 0 }
   0xf   : > { %s1409_s20 = scalar_select %p1171_p8, 1, 0 }
  0x10   : > { %p1176_p10 = por %p120_p7, %p88_p2  ;;  %p127_p11 = scmp.lt.s32.totalorder %s1093_s14, 3 }
  0x11   : > { %s1095_s23 = smov [#allocation3]   ;;  %p842_p1 = scmp.lt.s32.totalorder %s1093_s14, 2 }
  0x12   : > { %s1410_s21 = scalar_select %p1176_p10, 1, 0 }
  0x13   : > { %p1181_p12 = pnand %p740_p9, %p127_p11  ;;  %s145_s24 = sshll.u32 %s1095_s23, 4  ;;  %s1185_s24 = int_to_ptr.vmem [resolvable:$true] %s145_s24 }
  0x14   : > { %p1199_p2 = pnand %p842_p1, %p1161_p4  ;;  %s34_s27 = sadd.s32 1, %s1089_s13 }
  0x15   : > { %s1411_s22 = scalar_select %p1181_p12, 1, 0 }
  0x16   : > { %p829_p13 = pneg %p1181_p12  ;;  %s949_s30 = scalar_lea.hbm %s1397_s0, 2048 }
  0x17   : > { %s1413_s26 = scalar_select %p1199_p2, 1, 0 }
  0x18   : > { %p1193_p5 = pnand %p829_p13, %p1157_p3  ;;  %p950_p7 = scmp.ne.s32.totalorder %s1397_s0, %s949_s30 }
  0x19   : > { %p956_p4 = scmp.lt.u32.totalorder %s949_s30, %s1397_s0 }
  0x1a   : > { %p951_p9 = pneg %p1193_p5 }
  0x1c   : > { %p952_p11 = pnand %p951_p9, %p950_p7 }
  0x1e   : > { %p953_p13 = pneg %p952_p11 }
  0x20   : > { %p958_p1 = pnand %p956_p4, %p953_p13 }
  0x22   : > { %961 = shalt.err (!%p958_p1)
}
  0x23   : > { %s962_s7 = scalar_lea.vmem %s1185_s24, 2048  ;;  %p970_p6 = scmp.lt.s32.totalorder %s1185_s24, %s1185_s24 }
  0x24   : > { %p963_p0 = scmp.ne.s32.totalorder %s1185_s24, %s962_s7  ;;  %p971_p3 = scmp.lt.s32.totalorder %s962_s7, %s962_s7 }
  0x26   : > { %p965_p10 = pnand %p963_p0, %p951_p9  ;;  %p972_p12 = por %p971_p3, %p970_p6 }
  0x28   : > { %p966_p8 = pneg %p965_p10 }
  0x2a   : > { %p973_p2 = pnand %p972_p12, %p966_p8 }
  0x2c   : > { %976 = shalt.err (!%p973_p2)
}
  0x2d   : > { %s1096_s8 = smov 256   ;;  %s1097_s15 = smov 16  }
  0x2e   : > { %832 = dma.hbm_to_vmem [thread:$0]  (!%p1193_p5), %s1397_s0, 2048, %s1185_s24, [#allocation4], %s1096_s8, %s1096_s8, %s1097_s15  }
  0x2f   : > { %p36_p10 = scmp.ge.s32.totalorder %s34_s27, 2  ;;  %s75_s23 = sadd.s32 1, %s1081_s11 }
  0x30   : > { %s159_s28 = sand.u32 1, %s1081_s11   ;;  %s787_s3 = sshll.u32 %s1089_s13, 7 }
  0x31   : > { %s1427_s27 = smov (%p36_p10, %s34_s27), 0  ;;  %s743_s29 = sshll.u32 %s159_s28, 8 }
  0x32   : > { %s71_s30 = ssub.s32 %s1089_s13, %s1427_s27  ;;  %s1237_s5 = scalar_lea.hbm %s1398_s1, %s787_s3 }
  0x33   : > { %p73_p3 = scmp.eq.s32.totalorder %s71_s30, 0  ;;  %s163_s24 = scalar_lea.vmem [#allocation6], %s743_s29 }
  0x34   : > { %s173_s6 = sshll.u32 %s163_s24, 4  ;;  %s1244_s15 = scalar_lea.sflag [#allocation7], %s159_s28  ;;  %s1242_s6 = int_to_ptr.vmem [resolvable:$true] %s173_s6 }
  0x35   : > { %s1240_s7 = scalar_select %p73_p3, %s1081_s11, %s75_s23  }
  0x36   : > { %s977_s16 = scalar_lea.hbm %s1237_s5, 4096  ;;  %p1414_p8 = scmp.ne.s32.totalorder %s1413_s26, 0 }
  0x37   : > { %p978_p6 = scmp.ne.s32.totalorder %s1237_s5, %s977_s16  ;;  %s982_s3 = scalar_lea.hbm %s1398_s1, 8192 }
  0x38   : > { %p979_p12 = pneg %p1414_p8  ;;  %p983_p2 = scmp.lt.u32.totalorder %s1237_s5, %s1398_s1 }
  0x39   : > { %p984_p7 = scmp.lt.u32.totalorder %s982_s3, %s977_s16  ;;  %p986_p11 = scmp.lt.u32.totalorder %s977_s16, %s1237_s5 }
  0x3a   : > { %p980_p0 = pnand %p979_p12, %p978_p6 }
  0x3b   : > { %p985_p9 = por %p984_p7, %p983_p2 }
  0x3c   : > { %p981_p5 = pneg %p980_p0 }
  0x3d   : > { %p987_p13 = por %p986_p11, %p985_p9 }
  0x3f   : > { %p988_p4 = pnand %p987_p13, %p981_p5 }
  0x41   : > { %991 = shalt.err (!%p988_p4)
}
  0x42   : > { %s992_s23 = scalar_lea.vmem %s1242_s6, 4096  ;;  %s1098_s28 = smov [#allocation6]  }
  0x43   : > { %p993_p1 = scmp.ne.s32.totalorder %s1242_s6, %s992_s23  ;;  %s997_s25 = sshll.u32 %s1098_s28, 4  ;;  %s998_s25 = int_to_ptr.vmem [resolvable:$false] %s997_s25 }
  0x44   : > { %s999_s24 = scalar_lea.vmem %s998_s25, 8192  ;;  %p1000_p6 = scmp.lt.s32.totalorder %s1242_s6, %s998_s25 }
  0x45   : > { %p995_p10 = pnand %p993_p1, %p979_p12  ;;  %p1001_p0 = scmp.lt.s32.totalorder %s999_s24, %s992_s23 }
  0x47   : > { %p996_p3 = pneg %p995_p10  ;;  %p1002_p2 = por %p1001_p0, %p1000_p6 }
  0x49   : > { %p1003_p7 = pnand %p1002_p2, %p996_p3 }
  0x4b   : > { %1006 = shalt.err (!%p1003_p7)
}
  0x4c   : > { %s1099_s16 = smov 128   ;;  %s1100_s18 = smov 8  }
  0x4d   : > { %836 = dma.hbm_to_vmem [thread:$0]  (!%p1414_p8), %s1237_s5, 4096, %s1242_s6, %s1244_s15, %s1096_s8, %s1099_s16, %s1100_s18  }
  0x4e   : > { %p1415_p12 = scmp.ne.s32.totalorder %s1411_s22, 0 }
  0x4f   : > { %p1416_p5 = scmp.ne.s32.totalorder (!%p1415_p12), %s1406_s17, 0 }
  0x50   : > { %185 = sbr.rel (%p1415_p12) target bundleno = 396 (0x18c), region = 28 }
  0x57   : > { %1060 = dma.done.wait (%p1416_p5), [#allocation4], 2048  }
  0x58   : > { %1062 = vsyncadd (%p1416_p5), [#allocation4], 4294965248  ;;  %s1280_s30 = sand.u32 1, %s1077_s10   ;;  %p1417_p8 = scmp.ne.s32.totalorder %s1408_s19, 0 }
  0x59   : > { %s748_s3 = sshll.u32 %s1280_s30, 8  ;;  %s192_s29 = scalar_lea.sflag [#allocation7], %s1280_s30 }
  0x5a   : > { %s1284_s26 = scalar_lea.vmem [#allocation6], %s748_s3 }
  0x5b   : > { %1064 = dma.done.wait (%p1417_p8), %s192_s29, 4096  }
  0x5c   : > { %1066 = vsyncadd (%p1417_p8), %s192_s29, 4294963200  ;;  %v901_v0 = vld [vmem:[%s1284_s26 + $0x4] ss:$8 sps:$4 sm:$0xff]   ;;  %v903_v1 = vld [vmem:[%s1284_s26] ss:$8 sps:$4 sm:$0xff]   ;;  %s749_s17 = sshll.u32 %s1280_s30, 7 }
  0x5d   : > { %474 = vmatprep.subr.bf16.mxu0 %v901_v0  ;;  %789 = vmatprep.subr.bf16.mxu1 %v901_v0  ;;  %v904_v2 = vld [vmem:[%s1284_s26 + $0x14] ss:$8 sps:$4 sm:$0xff]   ;;  %v906_v3 = vld [vmem:[%s1284_s26 + $0x10] ss:$8 sps:$4 sm:$0xff]   ;;  %v907_v4 = vld [vmem:[%s1284_s26 + $0x24] ss:$8 sps:$4 sm:$0xff]  }
  0x5e   : > { %475 = vmatpush1.bf16.msra.mxu0 %v903_v1  ;;  %805 = vmatpush1.bf16.msra.mxu1 %v903_v1  ;;  %v909_v5 = vld [vmem:[%s1284_s26 + $0x20] ss:$8 sps:$4 sm:$0xff]   ;;  %v910_v6 = vld [vmem:[%s1284_s26 + $0x34] ss:$8 sps:$4 sm:$0xff]   ;;  %v912_v7 = vld [vmem:[%s1284_s26 + $0x30] ss:$8 sps:$4 sm:$0xff]  }
  0x5f   : > { %476 = vmatprep.subr.bf16.mxu0 %v904_v2  ;;  %790 = vmatprep.subr.bf16.mxu1 %v904_v2  ;;  %v913_v8 = vld [vmem:[%s1284_s26 + $0x44] ss:$8 sps:$4 sm:$0xff]   ;;  %v915_v9 = vld [vmem:[%s1284_s26 + $0x40] ss:$8 sps:$4 sm:$0xff]   ;;  %v916_v10 = vld [vmem:[%s1284_s26 + $0x54] ss:$8 sps:$4 sm:$0xff]  }
  0x60   : > { %v918_v11 = vld [vmem:[%s1284_s26 + $0x50] ss:$8 sps:$4 sm:$0xff]   ;;  %v919_v12 = vld [vmem:[%s1284_s26 + $0x64] ss:$8 sps:$4 sm:$0xff]   ;;  %v921_v18 = vld [vmem:[%s1284_s26 + $0x60] ss:$8 sps:$4 sm:$0xff]  }
  0x61   : > { %v259_v13 = vld [vmem:[#allocation3 + $0x8] sm:$0xff]  ;;  %v261_v14 = vld [vmem:[#allocation3 + $0x18] sm:$0xff]  ;;  %v258_v38 = vld [vmem:[#allocation3] sm:$0xff]  ;;  %s1323_s19 = scalar_lea.vmem [#allocation8], %s749_s17  ;;  %s788_s22 = sshll.u32 %s1085_s12, 8 }
  0x62   : > { %477 = vmatpush1.bf16.msra.mxu0 %v906_v3  ;;  %806 = vmatpush1.bf16.msra.mxu1 %v906_v3  ;;  %v275_v15 = vpack.c.bf16 %v261_v14, %v259_v13  ;;  %v267_v16 = vld [vmem:[#allocation3 + $0x48] sm:$0xff]  ;;  %v269_v17 = vld [vmem:[#allocation3 + $0x58] sm:$0xff]  ;;  %v260_v39 = vld [vmem:[#allocation3 + $0x10] sm:$0xff]  ;;  %s631_s8 = sshll.u32 %s1323_s19, 4  ;;  %s1338_s15 = scalar_lea.hbm %s1399_s2, %s788_s22  ;;  %s1342_s8 = int_to_ptr.vmem [resolvable:$true] %s631_s8 }
  0x63   : > { %478 = vmatprep.subr.bf16.mxu0 %v907_v4  ;;  %791 = vmatprep.subr.bf16.mxu1 %v907_v4  ;;  %v279_v19 = vpack.c.bf16 %v269_v17, %v267_v16  ;;  %v922_v20 = vld [vmem:[%s1284_s26 + $0x74] ss:$8 sps:$4 sm:$0xff]   ;;  %v924_v21 = vld [vmem:[%s1284_s26 + $0x70] ss:$8 sps:$4 sm:$0xff]   ;;  %v925_v22 = vld [vmem:[%s1284_s26 + $0x84] ss:$8 sps:$4 sm:$0xff]   ;;  %v274_v46 = vpack.c.bf16 %v260_v39, %v258_v38 }
  0x64   : > { %506 = vmatprep.mubr.bf16.mxu0 %v275_v15  ;;  %v927_v23 = vld [vmem:[%s1284_s26 + $0x80] ss:$8 sps:$4 sm:$0xff]   ;;  %v928_v24 = vld [vmem:[%s1284_s26 + $0x94] ss:$8 sps:$4 sm:$0xff]   ;;  %v930_v25 = vld [vmem:[%s1284_s26 + $0x90] ss:$8 sps:$4 sm:$0xff]  }
  0x65   : > { %526 = vmatprep.mubr.bf16.mxu1 %v279_v19  ;;  %v931_v26 = vld [vmem:[%s1284_s26 + $0xa4] ss:$8 sps:$4 sm:$0xff]   ;;  %v933_v27 = vld [vmem:[%s1284_s26 + $0xa0] ss:$8 sps:$4 sm:$0xff]   ;;  %v934_v28 = vld [vmem:[%s1284_s26 + $0xb4] ss:$8 sps:$4 sm:$0xff]  }
  0x66   : > { %479 = vmatpush1.bf16.msra.mxu0 %v909_v5  ;;  %807 = vmatpush1.bf16.msra.mxu1 %v909_v5  ;;  %v936_v29 = vld [vmem:[%s1284_s26 + $0xb0] ss:$8 sps:$4 sm:$0xff]   ;;  %v937_v30 = vld [vmem:[%s1284_s26 + $0xc4] ss:$8 sps:$4 sm:$0xff]   ;;  %v939_v31 = vld [vmem:[%s1284_s26 + $0xc0] ss:$8 sps:$4 sm:$0xff]  }
  0x67   : > { %480 = vmatprep.subr.bf16.mxu0 %v910_v6  ;;  %792 = vmatprep.subr.bf16.mxu1 %v910_v6  ;;  %v940_v32 = vld [vmem:[%s1284_s26 + $0xd4] ss:$8 sps:$4 sm:$0xff]   ;;  %v942_v33 = vld [vmem:[%s1284_s26 + $0xd0] ss:$8 sps:$4 sm:$0xff]   ;;  %v943_v34 = vld [vmem:[%s1284_s26 + $0xe4] ss:$8 sps:$4 sm:$0xff]  }
  0x68   : > { %v945_v35 = vld [vmem:[%s1284_s26 + $0xe0] ss:$8 sps:$4 sm:$0xff]   ;;  %v946_v36 = vld [vmem:[%s1284_s26 + $0xf4] ss:$8 sps:$4 sm:$0xff]   ;;  %v948_v37 = vld [vmem:[%s1284_s26 + $0xf0] ss:$8 sps:$4 sm:$0xff]  }
  0x69   : > { %v266_v40 = vld [vmem:[#allocation3 + $0x40] sm:$0xff]  ;;  %v268_v41 = vld [vmem:[#allocation3 + $0x50] sm:$0xff]  ;;  %v263_v42 = vld [vmem:[#allocation3 + $0x28] sm:$0xff]  ;;  %s615_s12 = scalar_lea.sflag [#allocation5], %s1280_s30  ;;  %s1007_s4 = scalar_lea.vmem %s1342_s8, 2048 }
  0x6a   : > { %481 = vmatpush1.bf16.msra.mxu0 %v912_v7  ;;  %808 = vmatpush1.bf16.msra.mxu1 %v912_v7  ;;  %v265_v43 = vld [vmem:[#allocation3 + $0x38] sm:$0xff]  ;;  %v271_v44 = vld [vmem:[#allocation3 + $0x68] sm:$0xff]  ;;  %v278_v47 = vpack.c.bf16 %v268_v41, %v266_v40  ;;  %v262_v50 = vld [vmem:[#allocation3 + $0x20] sm:$0xff]  ;;  %p1008_p9 = scmp.ne.s32.totalorder %s1342_s8, %s1007_s4  ;;  %p1418_p11 = scmp.ne.s32.totalorder %s1409_s20, 0 }
  0x6b   : > { %482 = vmatprep.subr.bf16.mxu0 %v913_v8  ;;  %793 = vmatprep.subr.bf16.mxu1 %v913_v8  ;;  %v273_v45 = vld [vmem:[#allocation3 + $0x78] sm:$0xff]  ;;  %v277_v48 = vpack.c.bf16 %v265_v43, %v263_v42  ;;  %v264_v51 = vld [vmem:[#allocation3 + $0x30] sm:$0xff]  ;;  %v270_v52 = vld [vmem:[#allocation3 + $0x60] sm:$0xff]  ;;  %s1101_s23 = smov [#allocation8]  }
  0x6c   : > { %v281_v49 = vpack.c.bf16 %v273_v45, %v271_v44  ;;  %v272_v53 = vld [vmem:[#allocation3 + $0x70] sm:$0xff]  ;;  %v276_v54 = vpack.c.bf16 %v264_v51, %v262_v50  ;;  %p1009_p13 = pnand %p1008_p9, %p1418_p11  ;;  %s1011_s28 = sshll.u32 %s1101_s23, 4  ;;  %s1012_s28 = int_to_ptr.vmem [resolvable:$false] %s1011_s28 }
  0x6d   : > { %v280_v55 = vpack.c.bf16 %v272_v53, %v270_v52  ;;  %s1013_s25 = scalar_lea.vmem %s1012_s28, 4096  ;;  %p1014_p1 = scmp.lt.s32.totalorder %s1342_s8, %s1012_s28 }
  0x6e   : > { %483 = vmatpush1.bf16.msra.mxu0 %v915_v9  ;;  %809 = vmatpush1.bf16.msra.mxu1 %v915_v9  ;;  %p1010_p4 = pneg %p1009_p13  ;;  %p1015_p10 = scmp.lt.s32.totalorder %s1013_s25, %s1007_s4 }
  0x6f   : > { %484 = vmatprep.subr.bf16.mxu0 %v916_v10  ;;  %794 = vmatprep.subr.bf16.mxu1 %v916_v10 }
  0x70   : > { %p1016_p3 = por %p1015_p10, %p1014_p1 }
  0x72   : > { %485 = vmatpush1.bf16.msra.mxu0 %v918_v11  ;;  %810 = vmatpush1.bf16.msra.mxu1 %v918_v11  ;;  %p1017_p6 = pnand %p1016_p3, %p1010_p4 }
  0x73   : > { %486 = vmatprep.subr.bf16.mxu0 %v919_v12  ;;  %795 = vmatprep.subr.bf16.mxu1 %v919_v12 }
  0x76   : > { %487 = vmatpush1.bf16.msra.mxu0 %v921_v18  ;;  %811 = vmatpush1.bf16.msra.mxu1 %v921_v18 }
  0x77   : > { %488 = vmatprep.subr.bf16.mxu0 %v922_v20  ;;  %796 = vmatprep.subr.bf16.mxu1 %v922_v20 }
  0x7a   : > { %489 = vmatpush1.bf16.msra.mxu0 %v924_v21  ;;  %812 = vmatpush1.bf16.msra.mxu1 %v924_v21 }
  0x7b   : > { %490 = vmatprep.subr.bf16.mxu0 %v925_v22  ;;  %797 = vmatprep.subr.bf16.mxu1 %v925_v22 }
  0x7e   : > { %491 = vmatpush1.bf16.msra.mxu0 %v927_v23  ;;  %813 = vmatpush1.bf16.msra.mxu1 %v927_v23 }
  0x7f   : > { %492 = vmatprep.subr.bf16.mxu0 %v928_v24  ;;  %798 = vmatprep.subr.bf16.mxu1 %v928_v24 }
  0x82   : > { %493 = vmatpush1.bf16.msra.mxu0 %v930_v25  ;;  %814 = vmatpush1.bf16.msra.mxu1 %v930_v25 }
  0x83   : > { %494 = vmatprep.subr.bf16.mxu0 %v931_v26  ;;  %799 = vmatprep.subr.bf16.mxu1 %v931_v26 }
  0x86   : > { %495 = vmatpush1.bf16.msra.mxu0 %v933_v27  ;;  %815 = vmatpush1.bf16.msra.mxu1 %v933_v27 }
  0x87   : > { %496 = vmatprep.subr.bf16.mxu0 %v934_v28  ;;  %800 = vmatprep.subr.bf16.mxu1 %v934_v28 }
  0x8a   : > { %497 = vmatpush1.bf16.msra.mxu0 %v936_v29  ;;  %816 = vmatpush1.bf16.msra.mxu1 %v936_v29 }
  0x8b   : > { %498 = vmatprep.subr.bf16.mxu0 %v937_v30  ;;  %801 = vmatprep.subr.bf16.mxu1 %v937_v30 }
  0x8e   : > { %499 = vmatpush1.bf16.msra.mxu0 %v939_v31  ;;  %817 = vmatpush1.bf16.msra.mxu1 %v939_v31 }
  0x8f   : > { %500 = vmatprep.subr.bf16.mxu0 %v940_v32  ;;  %802 = vmatprep.subr.bf16.mxu1 %v940_v32 }
  0x92   : > { %501 = vmatpush1.bf16.msra.mxu0 %v942_v33  ;;  %818 = vmatpush1.bf16.msra.mxu1 %v942_v33 }
  0x93   : > { %502 = vmatprep.subr.bf16.mxu0 %v943_v34  ;;  %803 = vmatprep.subr.bf16.mxu1 %v943_v34 }
  0x96   : > { %503 = vmatpush1.bf16.msra.mxu0 %v945_v35  ;;  %819 = vmatpush1.bf16.msra.mxu1 %v945_v35 }
  0x97   : > { %504 = vmatprep.subr.bf16.mxu0 %v946_v36  ;;  %804 = vmatprep.subr.bf16.mxu1 %v946_v36 }
  0x9a   : > { %505 = vmatpush1.bf16.msra.mxu0 %v948_v37  ;;  %820 = vmatpush1.bf16.msra.mxu1 %v948_v37 }
  0x9d   : > { %507 = vmatmul.mubr.bf16.vlgmr.msra.gmra.mrb[0].mxu0 %v274_v46  ;;  %527 = vmatmul.mubr.bf16.vlgmr.msra.gmra.mrb[0].mxu1 %v278_v47 }
  0x9e   : > { %516 = vmatprep.mubr.bf16.mxu0 %v277_v48  ;;  %536 = vmatprep.mubr.bf16.mxu1 %v281_v49 }
  0xa5   : > { %517 = vmatmul.mubr.bf16.gmra.mrb[4].mxu0 %v276_v54  ;;  %537 = vmatmul.mubr.bf16.gmra.mrb[4].mxu1 %v280_v55 }
 0x170   : > { %v508_v56 = vpop.f32.mrb[0].mxu0  ;;  %v528_v57 = vpop.f32.mrb[0].mxu1 }
 0x171   : > { %598 = vst [vmem:[%s1323_s19] sm:$0xff] %v508_v56  ;;  %606 = vst [vmem:[%s1323_s19 + $0x40] sm:$0xff] %v528_v57  ;;  %v510_v58 = vpop.f32.mrb[1].mxu0  ;;  %v530_v59 = vpop.f32.mrb[1].mxu1 }
 0x172   : > { %599 = vst [vmem:[%s1323_s19 + $0x8] sm:$0xff] %v510_v58  ;;  %607 = vst [vmem:[%s1323_s19 + $0x48] sm:$0xff] %v530_v59  ;;  %v512_v60 = vpop.f32.mrb[2].mxu0  ;;  %v532_v61 = vpop.f32.mrb[2].mxu1 }
 0x173   : > { %600 = vst [vmem:[%s1323_s19 + $0x10] sm:$0xff] %v512_v60  ;;  %608 = vst [vmem:[%s1323_s19 + $0x50] sm:$0xff] %v532_v61  ;;  %v514_v62 = vpop.f32.mrb[3].mxu0  ;;  %v534_v63 = vpop.f32.mrb[3].mxu1 }
 0x174   : > { %601 = vst [vmem:[%s1323_s19 + $0x18] sm:$0xff] %v514_v62  ;;  %609 = vst [vmem:[%s1323_s19 + $0x58] sm:$0xff] %v534_v63 }
 0x178   : > { %v518_v0 = vpop.f32.mrb[4].mxu0  ;;  %v538_v1 = vpop.f32.mrb[4].mxu1 }
 0x179   : > { %602 = vst [vmem:[%s1323_s19 + $0x20] sm:$0xff] %v518_v0  ;;  %610 = vst [vmem:[%s1323_s19 + $0x60] sm:$0xff] %v538_v1  ;;  %v520_v2 = vpop.f32.mrb[5].mxu0  ;;  %v540_v3 = vpop.f32.mrb[5].mxu1 }
 0x17a   : > { %603 = vst [vmem:[%s1323_s19 + $0x28] sm:$0xff] %v520_v2  ;;  %611 = vst [vmem:[%s1323_s19 + $0x68] sm:$0xff] %v540_v3  ;;  %v522_v4 = vpop.f32.mrb[6].mxu0  ;;  %v542_v5 = vpop.f32.mrb[6].mxu1 }
 0x17b   : > { %604 = vst [vmem:[%s1323_s19 + $0x30] sm:$0xff] %v522_v4  ;;  %612 = vst [vmem:[%s1323_s19 + $0x70] sm:$0xff] %v542_v5  ;;  %v524_v6 = vpop.f32.mrb[7].mxu0  ;;  %v544_v7 = vpop.f32.mrb[7].mxu1 }
 0x17c   : > { %605 = vst [vmem:[%s1323_s19 + $0x38] sm:$0xff] %v524_v6  ;;  %613 = vst [vmem:[%s1323_s19 + $0x78] sm:$0xff] %v544_v7 }
 0x17d   : > { %1020 = shalt.err (!%p1017_p6)
}
 0x17e   : > { %s1021_s24 = scalar_lea.hbm %s1338_s15, 2048  ;;  %s1025_s3 = scalar_lea.hbm %s1399_s2, 4096 }
 0x17f   : > { %p1022_p0 = scmp.ne.s32.totalorder %s1338_s15, %s1021_s24  ;;  %p1026_p12 = scmp.lt.u32.totalorder %s1338_s15, %s1399_s2 }
 0x180   : > { %p1027_p5 = scmp.lt.u32.totalorder %s1025_s3, %s1021_s24  ;;  %p1029_p9 = scmp.lt.u32.totalorder %s1021_s24, %s1338_s15 }
 0x181   : > { %p1023_p2 = pnand %p1022_p0, %p1418_p11 }
 0x182   : > { %p1028_p8 = por %p1027_p5, %p1026_p12 }
 0x183   : > { %p1024_p7 = pneg %p1023_p2 }
 0x184   : > { %p1030_p13 = por %p1029_p9, %p1028_p8 }
 0x186   : > { %p1031_p4 = pnand %p1030_p13, %p1024_p7 }
 0x188   : > { %1034 = shalt.err (!%p1031_p4)
}
 0x189   : > { %s1102_s17 = smov 256   ;;  %s1103_s19 = smov 512  }
 0x18a   : > { %s1104_s22 = smov 16  }
 0x18b   : > { %827 = dma.vmem_to_hbm [thread:$0]  (%p1418_p11), %s1342_s8, 2048, %s1338_s15, %s615_s12, %s1102_s17, %s1103_s19, %s1104_s22  }
 0x18c PF: > { %s646_s5 = sand.u32 1, %s1073_s9   ;;  %p1419_p1 = scmp.ne.s32.totalorder %s1410_s21, 0 }
 0x18d   : > { %p1420_p10 = scmp.ge.s32.totalorder %s1093_s14, 2  ;;  %s647_s6 = scalar_lea.sflag [#allocation5], %s646_s5 }
 0x18f   : > { %p838_p3 = pnand %p1420_p10, %p1419_p1 }
 0x191   : > { %1068 = dma.done.wait (!%p838_p3), %s647_s6, 2048  }
 0x192   : > { %1070 = vsyncadd (!%p838_p3), %s647_s6, 4294965248  ;;  %s19_s14 = sadd.s32 1, %s1093_s14   ;;  %s1421_s9 = smov %s1077_s10 }
 0x193   : > { %p16_p6 = scmp.ge.s32.totalorder %s19_s14, 4   ;;  %s1422_s10 = smov %s1081_s11 }
 0x194   : > { %s1423_s11 = smov %s1240_s7  ;;  %s1424_s12 = smov %s1089_s13 }
 0x195   : > { %s1425_s13 = smov %s1427_s27  ;;  %18 = sbr.rel (!%p16_p6) target bundleno = 7 (0x7), region = 87 }
 0x19c   :  { %652 = vsyncpa [#allocation4], 1 }
 0x19d   :  { %654 = vsyncpa [#allocation4 + $0x1], 1 }
 0x19e   :  { %655 = vsyncpa [#allocation7], 1 }
 0x19f   :  { %657 = vsyncpa [#allocation7 + $0x1], 1 }
 0x1a0   :  { %658 = vsyncpa [#allocation5], 1 }
 0x1a1   :  { %660 = vsyncpa [#allocation5 + $0x1], 1 }

</bundles_post_ra>
